<compile_context>
chip_gen: v6e
topology: v6e:2x2x1
jax: 0.10.0
libtpu: 0.0.40
codegen_flags: <defaults>
</compile_context>

<pallas_src>
import jax
import jax.numpy as jnp
from jax.experimental import pallas as pl
from jax.experimental.pallas import tpu as pltpu


# ---------------------------------------------------------------------------- kernel
def dqn_kernel(x_ref, w1_ref, b1_ref, wva_ref, bva_ref, wout_ref, bout_ref, q_ref):
    # fp32 -> bf16 cast on the VPU (huge slack here); avoids a separate XLA cast pass.
    x = x_ref[...].astype(jnp.bfloat16)                                # (TB, D_in)

    # shared layer: Linear(D_in, H) + ReLU   (bf16 operands, fp32 accumulate)
    h = jnp.dot(x, w1_ref[...], preferred_element_type=jnp.float32) + b1_ref[...]
    h = jnp.maximum(h, 0.0).astype(jnp.bfloat16)                       # (TB, H)

    # fused value+advantage hidden layer: one (H, 2H) matmul + ReLU
    va = jnp.dot(h, wva_ref[...], preferred_element_type=jnp.float32) + bva_ref[...]
    va = jnp.maximum(va, 0.0).astype(jnp.bfloat16)                     # (TB, 2H)

    # fused output layer: weights already encode v-broadcast, advantage projection and
    # the dueling mean-subtraction. Compact (TB, A) store -> minimal HBM writeback.
    q = jnp.dot(va, wout_ref[...], preferred_element_type=jnp.float32) + bout_ref[...]
    q_ref[...] = q.astype(q_ref.dtype)                                 # (TB, A)


# ---------------------------------------------------------------------------- weight fusion
def _fuse_params(params):
    """Fold the dueling head (5 Linears + combine) into 3 matmul weights/biases."""
    H = params["w1"].shape[1]
    A = params["wa2"].shape[1]

    w_va = jnp.concatenate([params["wv1"], params["wa1"]], axis=1)      # (H, 2H)
    b_va = jnp.concatenate([params["bv1"], params["ba1"]], axis=1)      # (1, 2H)

    comb = jnp.eye(A, dtype=jnp.float32) - 1.0 / A                      # I - (1/A)*11^T
    w_out = jnp.concatenate(
        [jnp.broadcast_to(params["wv2"], (H, A)),                       # value broadcast
         params["wa2"] @ comb],                                         # advantage - mean
        axis=0)                                                         # (2H, A)
    # robust to any bias shape holding a single value for bv2
    b_out = params["bv2"].reshape(1, 1) + params["ba2"].reshape(1, A) @ comb   # (1, A)

    # bf16 MXU operands; biases stay fp32 (added to the fp32 accumulator).
    return (params["w1"].astype(jnp.bfloat16), params["b1"],
            w_va.astype(jnp.bfloat16), b_va,
            w_out.astype(jnp.bfloat16), b_out)


# ---------------------------------------------------------------------------- tiling
def _pick_tile(B, block_b):
    """Batch tile: whole batch for small B; otherwise a large tile (multiple of 8)
    sized so the grid has >= 2 steps (v7x: shards across both TensorCores)."""
    if B <= 512:
        return B                       # single block; launch-overhead regime anyway
    tb = min(block_b, -(-B // 2))      # at least 2 grid steps
    tb = max(8, (tb // 8) * 8)         # sublane-aligned tile
    return tb


# ---------------------------------------------------------------------------- wrapper
def dqn_forward(x, params, *, block_b=2048):
    B, d_in = x.shape
    H = params["w1"].shape[1]
    A = params["wa2"].shape[1]

    w1, b1, w_va, b_va, w_out, b_out = _fuse_params(params)

    tb = _pick_tile(B, block_b)
    grid = (pl.cdiv(B, tb),)

    flops = 2 * B * (d_in * H + H * 2 * H + 2 * H * A)
    bytes_accessed = (B * d_in * 4 + B * A * 4                     # x in, q out (fp32)
                      + d_in * H * 2 + H * 4                       # w1, b1
                      + H * 2 * H * 2 + 2 * H * 4                  # w_va, b_va
                      + 2 * H * A * 2 + A * 4)                     # w_out, b_out

    q = pl.pallas_call(
        dqn_kernel,
        out_shape=jax.ShapeDtypeStruct((B, A), jnp.float32),
        grid_spec=pltpu.PrefetchScalarGridSpec(
            num_scalar_prefetch=0,
            grid=grid,
            in_specs=[
                pl.BlockSpec((tb, d_in), lambda i: (i, 0)),          # x: tiled over batch
                pl.BlockSpec((d_in, H), lambda i: (0, 0)),           # W1   (VMEM-resident)
                pl.BlockSpec((1, H), lambda i: (0, 0)),              # b1
                pl.BlockSpec((H, 2 * H), lambda i: (0, 0)),          # W_va
                pl.BlockSpec((1, 2 * H), lambda i: (0, 0)),          # b_va
                pl.BlockSpec((2 * H, A), lambda i: (0, 0)),          # W_out (compact)
                pl.BlockSpec((1, A), lambda i: (0, 0)),              # b_out
            ],
            out_specs=pl.BlockSpec((tb, A), lambda i: (i, 0)),       # compact (B, A) output
        ),
        compiler_params=pltpu.CompilerParams(
            dimension_semantics=("parallel",),                       # 2 TCs on v7x
            vmem_limit_bytes=48 * 1024 * 1024),                      # >v5e 16MiB default,
                                                                     # headroom on v7x 64MiB
        cost_estimate=pl.CostEstimate(flops=flops, transcendentals=0,
                                      bytes_accessed=bytes_accessed),
    )(x, w1, b1, w_va, b_va, w_out, b_out)

    return q


# ---------------------------------------------------------------------------- init / refs
def xavier_uniform(key, fan_in, fan_out):
    # matches torch.nn.init.xavier_uniform_ distribution; stored as (in, out)
    limit = jnp.sqrt(6.0 / (fan_in + fan_out))
    return jax.random.uniform(key, (fan_in, fan_out), jnp.float32, -limit, limit)


def init_params(key, input_size=20, hidden=128, output_size=4):
    ks = jax.random.split(key, 5)
    return {
        "w1":  xavier_uniform(ks[0], input_size, hidden),
        "b1":  jnp.zeros((1, hidden), jnp.float32),
        "wv1": xavier_uniform(ks[1], hidden, hidden),
        "bv1": jnp.zeros((1, hidden), jnp.float32),
        "wv2": xavier_uniform(ks[2], hidden, 1),
        "bv2": jnp.zeros((1, 1), jnp.float32),
        "wa1": xavier_uniform(ks[3], hidden, hidden),
        "ba1": jnp.zeros((1, hidden), jnp.float32),
        "wa2": xavier_uniform(ks[4], hidden, output_size),
        "ba2": jnp.zeros((1, output_size), jnp.float32),
    }


def dqn_reference_fp32(x, p):
    # pure-fp32 reference with the exact PyTorch forward semantics
    h = jnp.maximum(x @ p["w1"] + p["b1"], 0.0)
    vh = jnp.maximum(h @ p["wv1"] + p["bv1"], 0.0)
    v = vh @ p["wv2"] + p["bv2"]
    ah = jnp.maximum(h @ p["wa1"] + p["ba1"], 0.0)
    a = ah @ p["wa2"] + p["ba2"]
    return v + a - jnp.mean(a, axis=1, keepdims=True)


def dqn_reference_fused_bf16(x, params):
    # pure-JAX model of the exact kernel math (same fused weights, same bf16 casts)
    w1, b1, w_va, b_va, w_out, b_out = _fuse_params(params)
    h = jnp.maximum(jnp.dot(x.astype(jnp.bfloat16), w1,
                            preferred_element_type=jnp.float32) + b1, 0.0).astype(jnp.bfloat16)
    va = jnp.maximum(jnp.dot(h, w_va,
                             preferred_element_type=jnp.float32) + b_va, 0.0).astype(jnp.bfloat16)
    return jnp.dot(va, w_out, preferred_element_type=jnp.float32) + b_out


if __name__ == "__main__":
    key = jax.random.PRNGKey(0)
    k_param, k_x, k_x2 = jax.random.split(key, 3)

    INPUT_SIZE, HIDDEN, OUTPUT_SIZE, BATCH = 20, 128, 4, 128
    params = init_params(k_param, INPUT_SIZE, HIDDEN, OUTPUT_SIZE)
    x = jax.random.normal(k_x, (BATCH, INPUT_SIZE), jnp.float32)

    # small batch: single block (whole batch in one grid step)
    q = dqn_forward(x, params)
    jax.block_until_ready(q)
    assert q.shape == (BATCH, OUTPUT_SIZE)

    # (1) tight check against a pure-JAX model of the exact kernel math (bf16 MXU ops)
    q_matched = dqn_reference_fused_bf16(x, params)
    assert jnp.allclose(q, q_matched, atol=5e-3, rtol=5e-3), "kernel vs matched bf16 ref mismatch"

    # (2) semantic check vs the fp32 PyTorch-equivalent forward (bf16 operands => looser tol)
    q_fp32 = dqn_reference_fp32(x, params)
    assert jnp.allclose(q, q_fp32, atol=1.5e-1, rtol=5e-2), "kernel vs fp32 reference mismatch"

    # (3) multi-step tiled path with a ragged last block (exercises batch pipeline,
    #     weight residency across grid steps and masked final-tile writeback)
    B2 = 1050
    x2 = jax.random.normal(k_x2, (B2, INPUT_SIZE), jnp.float32)
    q2 = dqn_forward(x2, params, block_b=512)
    jax.block_until_ready(q2)
    assert q2.shape == (B2, OUTPUT_SIZE)
    q2_ref = dqn_reference_fused_bf16(x2, params)
    assert jnp.allclose(q2, q2_ref, atol=5e-3, rtol=5e-3), "tiled kernel vs bf16 ref mismatch"

    print("KERNEL_OK")
</pallas_src>

<mosaic_0001>
module attributes {stable_mosaic.version = 11 : i64} {
  func.func @dqn_kernel(%arg0: i32, %arg1: memref<128x20xf32, #tpu.memory_space<vmem>>, %arg2: memref<20x128xbf16, #tpu.memory_space<vmem>>, %arg3: memref<1x128xf32, #tpu.memory_space<vmem>>, %arg4: memref<128x256xbf16, #tpu.memory_space<vmem>>, %arg5: memref<1x256xf32, #tpu.memory_space<vmem>>, %arg6: memref<256x4xbf16, #tpu.memory_space<vmem>>, %arg7: memref<1x4xf32, #tpu.memory_space<vmem>>, %arg8: memref<128x4xf32, #tpu.memory_space<vmem>>) attributes {dimension_semantics = [#tpu.dimension_semantics<parallel>], iteration_bounds = array<i64: 1>, scalar_prefetch = 0 : i64, scratch_operands = 0 : i64, tpu.core_type = #tpu.core_type<tc>, window_params = [{transform_indices = @transform_0, window_bounds = array<i64: 128, 20>}, {pipeline_mode = #tpu.pipeline_mode<synchronous>, transform_indices = @transform_1, window_bounds = array<i64: 20, 128>}, {pipeline_mode = #tpu.pipeline_mode<synchronous>, transform_indices = @transform_2, window_bounds = array<i64: 1, 128>}, {pipeline_mode = #tpu.pipeline_mode<synchronous>, transform_indices = @transform_3, window_bounds = array<i64: 128, 256>}, {pipeline_mode = #tpu.pipeline_mode<synchronous>, transform_indices = @transform_4, window_bounds = array<i64: 1, 256>}, {pipeline_mode = #tpu.pipeline_mode<synchronous>, transform_indices = @transform_5, window_bounds = array<i64: 256, 4>}, {pipeline_mode = #tpu.pipeline_mode<synchronous>, transform_indices = @transform_6, window_bounds = array<i64: 1, 4>}, {transform_indices = @transform_7, window_bounds = array<i64: 128, 4>}]} {
    %c0 = arith.constant 0 : index
    %c0_0 = arith.constant 0 : index
    %0 = vector.load %arg1[%c0, %c0_0] : memref<128x20xf32, #tpu.memory_space<vmem>>, vector<128x20xf32>
    %1 = arith.truncf %0 : vector<128x20xf32> to vector<128x20xbf16>
    %c0_1 = arith.constant 0 : index
    %c0_2 = arith.constant 0 : index
    %2 = vector.load %arg2[%c0_1, %c0_2] : memref<20x128xbf16, #tpu.memory_space<vmem>>, vector<20x128xbf16>
    %cst = arith.constant dense<0.000000e+00> : vector<128x128xf32>
    %3 = tpu.matmul %1, %2, %cst {dimension_numbers = #tpu.dot_dimension_numbers<[1], [0], [0], [1], [0, 0, 1, 1], [], []>} : vector<128x20xbf16>, vector<20x128xbf16>, vector<128x128xf32> -> vector<128x128xf32>
    %c0_3 = arith.constant 0 : index
    %c0_4 = arith.constant 0 : index
    %4 = vector.load %arg3[%c0_3, %c0_4] : memref<1x128xf32, #tpu.memory_space<vmem>>, vector<1x128xf32>
    %5 = vector.broadcast %4 : vector<1x128xf32> to vector<128x128xf32>
    %6 = arith.addf %3, %5 : vector<128x128xf32>
    %cst_5 = arith.constant 0.000000e+00 : f32
    %7 = vector.broadcast %cst_5 : f32 to vector<128x128xf32>
    %8 = arith.maximumf %6, %7 : vector<128x128xf32>
    %9 = arith.truncf %8 : vector<128x128xf32> to vector<128x128xbf16>
    %c0_6 = arith.constant 0 : index
    %c0_7 = arith.constant 0 : index
    %10 = vector.load %arg4[%c0_6, %c0_7] : memref<128x256xbf16, #tpu.memory_space<vmem>>, vector<128x256xbf16>
    %cst_8 = arith.constant dense<0.000000e+00> : vector<128x256xf32>
    %11 = tpu.matmul %9, %10, %cst_8 {dimension_numbers = #tpu.dot_dimension_numbers<[1], [0], [0], [1], [0, 0, 1, 1], [], []>} : vector<128x128xbf16>, vector<128x256xbf16>, vector<128x256xf32> -> vector<128x256xf32>
    %c0_9 = arith.constant 0 : index
    %c0_10 = arith.constant 0 : index
    %12 = vector.load %arg5[%c0_9, %c0_10] : memref<1x256xf32, #tpu.memory_space<vmem>>, vector<1x256xf32>
    %13 = vector.broadcast %12 : vector<1x256xf32> to vector<128x256xf32>
    %14 = arith.addf %11, %13 : vector<128x256xf32>
    %cst_11 = arith.constant 0.000000e+00 : f32
    %15 = vector.broadcast %cst_11 : f32 to vector<128x256xf32>
    %16 = arith.maximumf %14, %15 : vector<128x256xf32>
    %17 = arith.truncf %16 : vector<128x256xf32> to vector<128x256xbf16>
    %c0_12 = arith.constant 0 : index
    %c0_13 = arith.constant 0 : index
    %18 = vector.load %arg6[%c0_12, %c0_13] : memref<256x4xbf16, #tpu.memory_space<vmem>>, vector<256x4xbf16>
    %cst_14 = arith.constant dense<0.000000e+00> : vector<128x4xf32>
    %19 = tpu.matmul %17, %18, %cst_14 {dimension_numbers = #tpu.dot_dimension_numbers<[1], [0], [0], [1], [0, 0, 1, 1], [], []>} : vector<128x256xbf16>, vector<256x4xbf16>, vector<128x4xf32> -> vector<128x4xf32>
    %c0_15 = arith.constant 0 : index
    %c0_16 = arith.constant 0 : index
    %20 = vector.load %arg7[%c0_15, %c0_16] : memref<1x4xf32, #tpu.memory_space<vmem>>, vector<1x4xf32>
    %21 = vector.broadcast %20 : vector<1x4xf32> to vector<128x4xf32>
    %22 = arith.addf %19, %21 : vector<128x4xf32>
    %c0_17 = arith.constant 0 : index
    %c0_18 = arith.constant 0 : index
    %23 = vector.load %arg8[%c0_17, %c0_18] : memref<128x4xf32, #tpu.memory_space<vmem>>, vector<128x4xf32>
    tpu.vector_store %arg8[%c0_17, %c0_18], %22 {strides = array<i32>} : memref<128x4xf32, #tpu.memory_space<vmem>>, vector<128x4xf32>,
    return
  }
  func.func @transform_0(%arg0: i32) -> (i32, i32) {
    %c0_i32 = arith.constant 0 : i32
    %c0_i32_0 = arith.constant 0 : i32
    return %arg0, %c0_i32 : i32, i32
  }
  func.func @transform_1(%arg0: i32) -> (i32, i32) {
    %c0_i32 = arith.constant 0 : i32
    %c0_i32_0 = arith.constant 0 : i32
    %c0_i32_1 = arith.constant 0 : i32
    return %c0_i32, %c0_i32_0 : i32, i32
  }
  func.func @transform_2(%arg0: i32) -> (i32, i32) {
    %c0_i32 = arith.constant 0 : i32
    %c0_i32_0 = arith.constant 0 : i32
    %c0_i32_1 = arith.constant 0 : i32
    return %c0_i32, %c0_i32_0 : i32, i32
  }
  func.func @transform_3(%arg0: i32) -> (i32, i32) {
    %c0_i32 = arith.constant 0 : i32
    %c0_i32_0 = arith.constant 0 : i32
    %c0_i32_1 = arith.constant 0 : i32
    return %c0_i32, %c0_i32_0 : i32, i32
  }
  func.func @transform_4(%arg0: i32) -> (i32, i32) {
    %c0_i32 = arith.constant 0 : i32
    %c0_i32_0 = arith.constant 0 : i32
    %c0_i32_1 = arith.constant 0 : i32
    return %c0_i32, %c0_i32_0 : i32, i32
  }
  func.func @transform_5(%arg0: i32) -> (i32, i32) {
    %c0_i32 = arith.constant 0 : i32
    %c0_i32_0 = arith.constant 0 : i32
    %c0_i32_1 = arith.constant 0 : i32
    return %c0_i32, %c0_i32_0 : i32, i32
  }
  func.func @transform_6(%arg0: i32) -> (i32, i32) {
    %c0_i32 = arith.constant 0 : i32
    %c0_i32_0 = arith.constant 0 : i32
    %c0_i32_1 = arith.constant 0 : i32
    return %c0_i32, %c0_i32_0 : i32, i32
  }
  func.func @transform_7(%arg0: i32) -> (i32, i32) {
    %c0_i32 = arith.constant 0 : i32
    %c0_i32_0 = arith.constant 0 : i32
    return %arg0, %c0_i32 : i32, i32
  }
}

</mosaic_0001>

<bundles_post_ra>
// kernel: tpu_custom_call.1
= control target key start
LH: loop header
LB: loop body
LE: loop exit
PB: predicated region body
PF: predicated region fallthrough
CT: control target
= control target key end

     0   :  { %vm95_vm0 = vcmask 1041408   ;;  %vm70_vm1 = vcmask 162816   ;;  %v924_v43 = vmov 0   ;;  %vm721_vm2 = vcmask 31744   ;;  %s1258_s1 = inlined_call_operand.vmem [shape: bf16[20,128], index: 1, kind: input, shape index: {}]   ;;  %s1259_s0 = inlined_call_operand.vmem [shape: f32[128,20], index: 0, kind: input, shape index: {}]   ;;  %s1260_s3 = inlined_call_operand.vmem [shape: bf16[128,256], index: 3, kind: input, shape index: {}]   ;;  %s1261_s5 = inlined_call_operand.vmem [shape: bf16[256,4], index: 5, kind: input, shape index: {}]   ;;  %s1262_s2 = inlined_call_operand.vmem [shape: f32[1,128], index: 2, kind: input, shape index: {}]   ;;  %s1263_s4 = inlined_call_operand.vmem [shape: f32[1,256], index: 4, kind: input, shape index: {}]   ;;  %s1264_s6 = inlined_call_operand.vmem [shape: f32[1,4], index: 6, kind: input, shape index: {}]   ;;  %s1265_s7 = inlined_call_operand.vmem [shape: f32[128,4], index: 7, kind: output, shape index: {}]  }
   0x1   :  { %v882_v0 = vld [vmem:[%s1258_s1 + $0x8] ss:$0 sps:$4 sm:$0x33]   ;;  %v883_v1 = vld [vmem:[%s1258_s1] sm:$0xff]   ;;  %v29_v6 = vld [vmem:[%s1259_s0 + $0x10] sm:$0xff]  ;;  %360 = vmatprep.mubr.bf16.mxu1 %v924_v43 }
   0x2   :  { %v27_v2 = vld [vmem:[%s1259_s0] sm:$0xff]  ;;  %880 = vmatprep.subr.msk.bf16.mxu0 %vm95_vm0, %v882_v0  ;;  %v97_v3 = vsel %vm95_vm0, %v882_v0, 0  ;;  %v28_v4 = vld [vmem:[%s1259_s0 + $0x8] sm:$0xff]  ;;  %v30_v7 = vld [vmem:[%s1259_s0 + $0x18] sm:$0xff] }
   0x3   :  { %861 = vmatpush3.bf16.msra.mxu0 %v97_v3  ;;  %v43_v5 = vpack.c.bf16 %v28_v4, %v27_v2  ;;  %v31_v8 = vld [vmem:[%s1259_s0 + $0x20] sm:$0xff]  ;;  %v32_v9 = vld [vmem:[%s1259_s0 + $0x28] sm:$0xff]  ;;  %v44_v10 = vpack.c.bf16 %v30_v7, %v29_v6  ;;  %v884_v12 = vld [vmem:[%s1260_s3 + $0x74] ss:$8 sps:$4 sm:$0xff]  }
   0x4   :  { %862 = vmatprep.subr.bf16.mxu0 %v883_v1  ;;  %v45_v11 = vpack.c.bf16 %v32_v9, %v31_v8  ;;  %v886_v13 = vld [vmem:[%s1260_s3 + $0x70] ss:$8 sps:$4 sm:$0xff]   ;;  %328 = vmatprep.subr.bf16.mxu1 %v884_v12  ;;  %v887_v16 = vld [vmem:[%s1260_s3 + $0x64] ss:$8 sps:$4 sm:$0xff]   ;;  %v889_v18 = vld [vmem:[%s1260_s3 + $0x60] ss:$8 sps:$4 sm:$0xff]  }
   0x5   :  { %864 = vmatprep.mubr.msk.bf16.mxu0 %vm70_vm1, %v43_v5  ;;  %v33_v14 = vld [vmem:[%s1259_s0 + $0x30] sm:$0xff]  ;;  %v34_v15 = vld [vmem:[%s1259_s0 + $0x38] sm:$0xff]  ;;  %v35_v17 = vld [vmem:[%s1259_s0 + $0x40] sm:$0xff]  ;;  %329 = vmatpush1.bf16.msra.mxu1 %v886_v13 }
   0x6   :  { %330 = vmatprep.subr.bf16.mxu1 %v887_v16  ;;  %v890_v19 = vld [vmem:[%s1260_s3 + $0x54] ss:$8 sps:$4 sm:$0xff]   ;;  %v36_v20 = vld [vmem:[%s1259_s0 + $0x48] sm:$0xff]  ;;  %v892_v21 = vld [vmem:[%s1260_s3 + $0x50] ss:$8 sps:$4 sm:$0xff]   ;;  %v46_v22 = vpack.c.bf16 %v34_v15, %v33_v14 }
   0x7   :  { %863 = vmatpush3.bf16.msra.mxu0 %v883_v1  ;;  %v47_v23 = vpack.c.bf16 %v36_v20, %v35_v17  ;;  %v893_v24 = vld [vmem:[%s1260_s3 + $0x44] ss:$8 sps:$4 sm:$0xff]   ;;  %v895_v25 = vld [vmem:[%s1260_s3 + $0x40] ss:$8 sps:$4 sm:$0xff]   ;;  %v37_v26 = vld [vmem:[%s1259_s0 + $0x50] sm:$0xff] }
   0x8   :  { %v38_v27 = vld [vmem:[%s1259_s0 + $0x58] sm:$0xff]  ;;  %v39_v29 = vld [vmem:[%s1259_s0 + $0x60] sm:$0xff]  ;;  %v40_v30 = vld [vmem:[%s1259_s0 + $0x68] sm:$0xff] }
   0x9   :  { %331 = vmatpush1.bf16.msra.mxu1 %v889_v18  ;;  %v896_v28 = vld [vmem:[%s1260_s3 + $0x34] ss:$8 sps:$4 sm:$0xff]   ;;  %v48_v31 = vpack.c.bf16 %v38_v27, %v37_v26  ;;  %v898_v32 = vld [vmem:[%s1260_s3 + $0x30] ss:$8 sps:$4 sm:$0xff]   ;;  %v49_v33 = vpack.c.bf16 %v40_v30, %v39_v29  ;;  %v899_v37 = vld [vmem:[%s1260_s3 + $0x24] ss:$8 sps:$4 sm:$0xff]  }
   0xa   :  { %865 = vmatmul.mubr.msk.bf16.vlgmr.msra.gmra.mxu0 %vm70_vm1, %v44_v10  ;;  %332 = vmatprep.subr.bf16.mxu1 %v890_v19  ;;  %v41_v34 = vld [vmem:[%s1259_s0 + $0x70] sm:$0xff]  ;;  %v42_v35 = vld [vmem:[%s1259_s0 + $0x78] sm:$0xff]  ;;  %v901_v38 = vld [vmem:[%s1260_s3 + $0x20] ss:$8 sps:$4 sm:$0xff]  }
   0xb   :  { %868 = vmatprep.mubr.msk.bf16.mxu0 %vm70_vm1, %v45_v11  ;;  %v50_v36 = vpack.c.bf16 %v42_v35, %v41_v34  ;;  %v902_v39 = vld [vmem:[%s1260_s3 + $0x14] ss:$8 sps:$4 sm:$0xff]   ;;  %v904_v40 = vld [vmem:[%s1260_s3 + $0x10] ss:$8 sps:$4 sm:$0xff]   ;;  %v905_v41 = vld [vmem:[%s1260_s3 + $0x4] ss:$8 sps:$4 sm:$0xff]  }
   0xc   :  { %v907_v42 = vld [vmem:[%s1260_s3] ss:$8 sps:$4 sm:$0xff]   ;;  %v908_v44 = vld [vmem:[%s1261_s5 + $0x78] sm:$0xff]   ;;  %v910_v46 = vld [vmem:[%s1261_s5 + $0x70] sm:$0xff]  }
   0xd   :  { %333 = vmatpush1.bf16.msra.mxu1 %v892_v21  ;;  %v909_v45 = vld [vmem:[%s1261_s5 + $0x38] sm:$0xff]   ;;  %796 = vmatprep.subr.bf16.mxu0 %v908_v44  ;;  %v911_v47 = vld [vmem:[%s1261_s5 + $0x30] sm:$0xff]   ;;  %v912_v48 = vld [vmem:[%s1261_s5 + $0x68] sm:$0xff]  }
   0xe   :  { %334 = vmatprep.subr.bf16.mxu1 %v893_v24  ;;  %797 = vmatpush3.bf16.msra.mxu0 %v909_v45  ;;  %v913_v49 = vld [vmem:[%s1261_s5 + $0x28] sm:$0xff]   ;;  %v914_v50 = vld [vmem:[%s1261_s5 + $0x60] sm:$0xff]   ;;  %v916_v52 = vld [vmem:[%s1261_s5 + $0x58] sm:$0xff]  }
   0xf   :  { %798 = vmatprep.subr.bf16.mxu0 %v910_v46  ;;  %v915_v51 = vld [vmem:[%s1261_s5 + $0x20] sm:$0xff]   ;;  %v917_v53 = vld [vmem:[%s1261_s5 + $0x18] sm:$0xff]  }
  0x10   :  { %v742_v56 = vld [vmem:[%s1262_s2] ss:$0 sm:$0xff] }
  0x11   :  { %335 = vmatpush1.bf16.msra.mxu1 %v895_v25 }
  0x12   :  { %869 = vmatmul.mubr.msk.bf16.gmra.mxu0 %vm70_vm1, %v46_v22  ;;  %336 = vmatprep.subr.bf16.mxu1 %v896_v28 }
  0x13   :  { %872 = vmatprep.mubr.msk.bf16.mxu0 %vm70_vm1, %v47_v23  ;;  %799 = vmatpush3.bf16.msra.mxu0 %v911_v47 }
  0x14   :  { %800 = vmatprep.subr.bf16.mxu0 %v912_v48  ;;  %v918_v48 = vld [vmem:[%s1261_s5 + $0x50] sm:$0xff]  }
  0x15   :  { %337 = vmatpush1.bf16.msra.mxu1 %v898_v32 }
  0x16   :  { %338 = vmatprep.subr.bf16.mxu1 %v899_v37 }
  0x17   :  { %801 = vmatpush3.bf16.msra.mxu0 %v913_v49  ;;  %v919_v49 = vld [vmem:[%s1261_s5 + $0x10] sm:$0xff]  }
  0x18   :  { %802 = vmatprep.subr.bf16.mxu0 %v914_v50  ;;  %v920_v50 = vld [vmem:[%s1261_s5 + $0x48] sm:$0xff]  }
  0x19   :  { %339 = vmatpush1.bf16.msra.mxu1 %v901_v38 }
  0x1a   :  { %873 = vmatmul.mubr.msk.bf16.gmra.mxu0 %vm70_vm1, %v48_v31  ;;  %340 = vmatprep.subr.bf16.mxu1 %v902_v39 }
  0x1b   :  { %876 = vmatprep.mubr.msk.bf16.mxu0 %vm70_vm1, %v49_v33  ;;  %803 = vmatpush3.bf16.msra.mxu0 %v915_v51  ;;  %v922_v51 = vld [vmem:[%s1261_s5 + $0x40] sm:$0xff]  }
  0x1c   :  { %804 = vmatprep.subr.bf16.mxu0 %v916_v52  ;;  %v923_v52 = vld [vmem:[%s1261_s5] sm:$0xff]  }
  0x1d   :  { %341 = vmatpush1.bf16.msra.mxu1 %v904_v40 }
  0x1e   :  { %342 = vmatprep.subr.bf16.mxu1 %v905_v41 }
  0x1f   :  { %805 = vmatpush3.bf16.msra.mxu0 %v917_v53  ;;  %v238_v53 = vlaneseq }
  0x20   :  { %806 = vmatprep.subr.bf16.mxu0 %v918_v48 }
  0x21   :  { %343 = vmatpush1.bf16.msra.mxu1 %v907_v42 }
  0x22   :  { %877 = vmatmul.mubr.msk.bf16.gmra.mxu0 %vm70_vm1, %v50_v36 }
  0x23   :  { %807 = vmatpush3.bf16.msra.mxu0 %v919_v49 }
  0x24   :  { %808 = vmatprep.subr.bf16.mxu0 %v920_v50 }
  0xca   :  { %v866_v54 = vpop.f32.mrf.mxu0 }
  0xcb   :  { %v142_v4 = vadd.f32 %v866_v54, %v742_v56  ;;  %v239_v54 = vshrl.u32 %v238_v53, 7 }
  0xcc   :  { %v133_v55 = vpop.f32.mrf.mxu0 }
  0xcd   :  { %v134_v58 = vadd.f32 %v742_v56, %v133_v55  ;;  %v198_v7 = vmax.f32 %v142_v4, 0.0  ;;  %v244_v55 = vsub.s32 1, %v239_v54 }
  0xce   :  { %v867_v57 = vpop.f32.mrf.mxu0 }
  0xcf   :  { %v196_v62 = vmax.f32 %v134_v58, 0.0  ;;  %v145_v1 = vadd.f32 %v867_v57, %v742_v56  ;;  %v236_v57 = vld [vmem:[%s1263_s4] sm:$0x3] }
  0xd0   :  { %v136_v59 = vpop.f32.mrf.mxu0 }
  0xd1   :  { %v137_v60 = vadd.f32 %v742_v56, %v136_v59  ;;  %v199_v5 = vmax.f32 %v145_v1, 0.0  ;;  %v1137_v59 = vrot.slane %v236_v57, %v244_v55 }
  0xd2   :  { %v870_v61 = vpop.f32.mrf.mxu0 }
  0xd3   :  { %v197_v63 = vmax.f32 %v137_v60, 0.0  ;;  %v213_v8 = vpack.c.bf16 %v199_v5, %v198_v7  ;;  %v158_v15 = vadd.f32 %v870_v61, %v742_v56 }
  0xd4   :  { %v149_v0 = vpop.f32.mrf.mxu0 }
  0xd5   :  { %v212_v2 = vpack.c.bf16 %v197_v63, %v196_v62  ;;  %v150_v9 = vadd.f32 %v742_v56, %v149_v0  ;;  %v202_v19 = vmax.f32 %v158_v15, 0.0 }
  0xd6   :  { %v871_v3 = vpop.f32.mrf.mxu0 }
  0xd7   :  { %361 = vmatmul.mubr.bf16.vlgmr.msra.gmra.mxu1 %v212_v2  ;;  %v200_v12 = vmax.f32 %v150_v9, 0.0  ;;  %v161_v16 = vadd.f32 %v871_v3, %v742_v56 }
  0xd8   :  { %370 = vmatprep.mubr.bf16.mxu1 %v924_v43  ;;  %v152_v6 = vpop.f32.mrf.mxu0 }
  0xd9   :  { %v153_v10 = vadd.f32 %v742_v56, %v152_v6  ;;  %v203_v20 = vmax.f32 %v161_v16, 0.0 }
  0xda   :  { %v874_v11 = vpop.f32.mrf.mxu0 }
  0xdb   :  { %v201_v13 = vmax.f32 %v153_v10, 0.0  ;;  %v215_v22 = vpack.c.bf16 %v203_v20, %v202_v19  ;;  %v174_v29 = vadd.f32 %v874_v11, %v742_v56 }
  0xdc   :  { %v165_v14 = vpop.f32.mrf.mxu0 }
  0xdd   :  { %v214_v17 = vpack.c.bf16 %v201_v13, %v200_v12  ;;  %v166_v23 = vadd.f32 %v742_v56, %v165_v14  ;;  %v206_v33 = vmax.f32 %v174_v29, 0.0 }
  0xde   :  { %v875_v18 = vpop.f32.mrf.mxu0 }
  0xdf   :  { %371 = vmatmul.mubr.bf16.gmra.mxu1 %v213_v8  ;;  %v204_v26 = vmax.f32 %v166_v23, 0.0  ;;  %v177_v30 = vadd.f32 %v875_v18, %v742_v56 }
  0xe0   :  { %380 = vmatprep.mubr.bf16.mxu1 %v924_v43  ;;  %v168_v21 = vpop.f32.mrf.mxu0 }
  0xe1   :  { %v169_v24 = vadd.f32 %v742_v56, %v168_v21  ;;  %v207_v34 = vmax.f32 %v177_v30, 0.0 }
  0xe2   :  { %v878_v25 = vpop.f32.mrf.mxu0 }
  0xe3   :  { %v205_v27 = vmax.f32 %v169_v24, 0.0  ;;  %v217_v36 = vpack.c.bf16 %v207_v34, %v206_v33  ;;  %v190_v41 = vadd.f32 %v878_v25, %v742_v56 }
  0xe4   :  { %v181_v28 = vpop.f32.mrf.mxu0 }
  0xe5   :  { %v216_v31 = vpack.c.bf16 %v205_v27, %v204_v26  ;;  %v182_v37 = vadd.f32 %v742_v56, %v181_v28  ;;  %v210_v45 = vmax.f32 %v190_v41, 0.0 }
  0xe6   :  { %v879_v32 = vpop.f32.mrf.mxu0 }
  0xe7   :  { %381 = vmatmul.mubr.bf16.gmra.mxu1 %v214_v17  ;;  %v208_v39 = vmax.f32 %v182_v37, 0.0  ;;  %v193_v42 = vadd.f32 %v879_v32, %v742_v56 }
  0xe8   :  { %390 = vmatprep.mubr.bf16.mxu1 %v924_v43  ;;  %v184_v35 = vpop.f32.mrf.mxu0 }
  0xe9   :  { %v185_v38 = vadd.f32 %v742_v56, %v184_v35  ;;  %v211_v46 = vmax.f32 %v193_v42, 0.0  ;;  %v240_v56 = vsub.s32 0, %v239_v54 }
  0xeb   :  { %v209_v40 = vmax.f32 %v185_v38, 0.0  ;;  %v219_v47 = vpack.c.bf16 %v211_v46, %v210_v45  ;;  %v1139_v60 = vrot.slane %v236_v57, %v240_v56 }
  0xed   :  { %v218_v44 = vpack.c.bf16 %v209_v40, %v208_v39 }
  0xef   :  { %391 = vmatmul.mubr.bf16.gmra.mxu1 %v215_v22 }
  0xf0   :  { %400 = vmatprep.mubr.bf16.mxu1 %v924_v43 }
  0xf7   :  { %401 = vmatmul.mubr.bf16.gmra.mxu1 %v216_v31 }
  0xf8   :  { %410 = vmatprep.mubr.bf16.mxu1 %v924_v43 }
  0xff   :  { %411 = vmatmul.mubr.bf16.gmra.mxu1 %v217_v36 }
 0x100   :  { %420 = vmatprep.mubr.bf16.mxu1 %v924_v43 }
 0x107   :  { %421 = vmatmul.mubr.bf16.gmra.mxu1 %v218_v44 }
 0x108   :  { %430 = vmatprep.mubr.bf16.mxu1 %v924_v43  ;;  %v921_v43 = vld [vmem:[%s1261_s5 + $0x8] sm:$0xff]  }
 0x109   :  { %809 = vmatpush3.bf16.msra.mxu0 %v921_v43 }
 0x10a   :  { %810 = vmatprep.subr.bf16.mxu0 %v922_v51 }
 0x10d   :  { %811 = vmatpush3.bf16.msra.mxu0 %v923_v52 }
 0x10f   :  { %431 = vmatmul.mubr.bf16.gmra.mxu1 %v219_v47 }
 0x197   :  { %v362_v58 = vpop.f32.mrf.mxu1 }
 0x198   :  { %v363_v1 = vadd.f32 %v362_v58, %v1139_v60 }
 0x199   :  { %v364_v61 = vpop.f32.mrf.mxu1 }
 0x19a   :  { %v365_v63 = vadd.f32 %v364_v61, %v1137_v59  ;;  %v441_v8 = vmax.f32 %v363_v1, 0.0 }
 0x19b   :  { %v366_v62 = vpop.f32.mrf.mxu1 }
 0x19c   :  { %v367_v0 = vadd.f32 %v366_v62, %v1139_v60  ;;  %v442_v6 = vmax.f32 %v365_v63, 0.0 }
 0x19d   :  { %v368_v2 = vpop.f32.mrf.mxu1 }
 0x19e   :  { %v369_v3 = vadd.f32 %v368_v2, %v1137_v59  ;;  %v443_v4 = vmax.f32 %v367_v0, 0.0 }
 0x19f   :  { %v372_v5 = vpop.f32.mrf.mxu1 }
 0x1a0   :  { %v444_v7 = vmax.f32 %v369_v3, 0.0  ;;  %v473_v11 = vpack.c.bf16 %v443_v4, %v441_v8  ;;  %v373_v15 = vadd.f32 %v372_v5, %v1139_v60 }
 0x1a1   :  { %v374_v9 = vpop.f32.mrf.mxu1 }
 0x1a2   :  { %v474_v10 = vpack.c.bf16 %v444_v7, %v442_v6  ;;  %v375_v13 = vadd.f32 %v374_v9, %v1137_v59  ;;  %v445_v22 = vmax.f32 %v373_v15, 0.0 }
 0x1a3   :  { %v376_v12 = vpop.f32.mrf.mxu1 }
 0x1a4   :  { %v377_v14 = vadd.f32 %v376_v12, %v1139_v60  ;;  %656 = vmatprep.mubr.bf16.mxu0 %v474_v10  ;;  %v446_v20 = vmax.f32 %v375_v13, 0.0 }
 0x1a5   :  { %v378_v16 = vpop.f32.mrf.mxu1  ;;  %657 = vmatmul.mubr.bf16.vlgmr.msra.gmra.mxu0 %v473_v11 }
 0x1a6   :  { %v379_v17 = vadd.f32 %v378_v16, %v1137_v59  ;;  %v447_v18 = vmax.f32 %v377_v14, 0.0 }
 0x1a7   :  { %v382_v19 = vpop.f32.mrf.mxu1 }
 0x1a8   :  { %v448_v21 = vmax.f32 %v379_v17, 0.0  ;;  %v475_v25 = vpack.c.bf16 %v447_v18, %v445_v22  ;;  %v383_v29 = vadd.f32 %v382_v19, %v1139_v60 }
 0x1a9   :  { %v384_v23 = vpop.f32.mrf.mxu1 }
 0x1aa   :  { %v476_v24 = vpack.c.bf16 %v448_v21, %v446_v20  ;;  %v385_v27 = vadd.f32 %v384_v23, %v1137_v59  ;;  %v449_v36 = vmax.f32 %v383_v29, 0.0 }
 0x1ab   :  { %v386_v26 = vpop.f32.mrf.mxu1 }
 0x1ac   :  { %v387_v28 = vadd.f32 %v386_v26, %v1139_v60  ;;  %664 = vmatprep.mubr.bf16.mxu0 %v476_v24  ;;  %v450_v34 = vmax.f32 %v385_v27, 0.0 }
 0x1ad   :  { %v388_v30 = vpop.f32.mrf.mxu1  ;;  %665 = vmatmul.mubr.bf16.gmra.mxu0 %v475_v25 }
 0x1ae   :  { %v389_v31 = vadd.f32 %v388_v30, %v1137_v59  ;;  %v451_v32 = vmax.f32 %v387_v28, 0.0 }
 0x1af   :  { %v392_v33 = vpop.f32.mrf.mxu1 }
 0x1b0   :  { %v452_v35 = vmax.f32 %v389_v31, 0.0  ;;  %v477_v39 = vpack.c.bf16 %v451_v32, %v449_v36  ;;  %v393_v44 = vadd.f32 %v392_v33, %v1139_v60 }
 0x1b1   :  { %v394_v37 = vpop.f32.mrf.mxu1 }
 0x1b2   :  { %v478_v38 = vpack.c.bf16 %v452_v35, %v450_v34  ;;  %v395_v41 = vadd.f32 %v394_v37, %v1137_v59  ;;  %v453_v43 = vmax.f32 %v393_v44, 0.0 }
 0x1b3   :  { %v396_v40 = vpop.f32.mrf.mxu1 }
 0x1b4   :  { %v397_v42 = vadd.f32 %v396_v40, %v1139_v60  ;;  %672 = vmatprep.mubr.bf16.mxu0 %v478_v38  ;;  %v454_v49 = vmax.f32 %v395_v41, 0.0 }
 0x1b5   :  { %v398_v45 = vpop.f32.mrf.mxu1  ;;  %673 = vmatmul.mubr.bf16.gmra.mxu0 %v477_v39 }
 0x1b6   :  { %v399_v46 = vadd.f32 %v398_v45, %v1137_v59  ;;  %v455_v47 = vmax.f32 %v397_v42, 0.0 }
 0x1b7   :  { %v402_v48 = vpop.f32.mrf.mxu1 }
 0x1b8   :  { %v456_v50 = vmax.f32 %v399_v46, 0.0  ;;  %v479_v53 = vpack.c.bf16 %v455_v47, %v453_v43  ;;  %v403_v57 = vadd.f32 %v402_v48, %v1139_v60  ;;  %v1176_v48 = vld [vmem:[%s1264_s6] ss:$0 sm:$0xff] }
 0x1b9   :  { %v404_v51 = vpop.f32.mrf.mxu1 }
 0x1ba   :  { %v480_v52 = vpack.c.bf16 %v456_v50, %v454_v49  ;;  %v405_v55 = vadd.f32 %v404_v51, %v1137_v59  ;;  %v457_v2 = vmax.f32 %v403_v57, 0.0 }
 0x1bb   :  { %v406_v54 = vpop.f32.mrf.mxu1 }
 0x1bc   :  { %v407_v56 = vadd.f32 %v406_v54, %v1139_v60  ;;  %680 = vmatprep.mubr.bf16.mxu0 %v480_v52  ;;  %v458_v0 = vmax.f32 %v405_v55, 0.0 }
 0x1bd   :  { %v408_v58 = vpop.f32.mrf.mxu1  ;;  %681 = vmatmul.mubr.bf16.gmra.mxu0 %v479_v53 }
 0x1be   :  { %v409_v61 = vadd.f32 %v408_v58, %v1137_v59  ;;  %v459_v62 = vmax.f32 %v407_v56, 0.0 }
 0x1bf   :  { %v412_v63 = vpop.f32.mrf.mxu1 }
 0x1c0   :  { %v460_v1 = vmax.f32 %v409_v61, 0.0  ;;  %v481_v5 = vpack.c.bf16 %v459_v62, %v457_v2  ;;  %v413_v9 = vadd.f32 %v412_v63, %v1139_v60 }
 0x1c1   :  { %v414_v3 = vpop.f32.mrf.mxu1 }
 0x1c2   :  { %v482_v4 = vpack.c.bf16 %v460_v1, %v458_v0  ;;  %v415_v7 = vadd.f32 %v414_v3, %v1137_v59  ;;  %v461_v16 = vmax.f32 %v413_v9, 0.0 }
 0x1c3   :  { %v416_v6 = vpop.f32.mrf.mxu1 }
 0x1c4   :  { %v417_v8 = vadd.f32 %v416_v6, %v1139_v60  ;;  %688 = vmatprep.mubr.bf16.mxu0 %v482_v4  ;;  %v462_v14 = vmax.f32 %v415_v7, 0.0 }
 0x1c5   :  { %v418_v10 = vpop.f32.mrf.mxu1  ;;  %689 = vmatmul.mubr.bf16.gmra.mxu0 %v481_v5 }
 0x1c6   :  { %v419_v11 = vadd.f32 %v418_v10, %v1137_v59  ;;  %v463_v12 = vmax.f32 %v417_v8, 0.0 }
 0x1c7   :  { %v422_v13 = vpop.f32.mrf.mxu1 }
 0x1c8   :  { %v464_v15 = vmax.f32 %v419_v11, 0.0  ;;  %v483_v19 = vpack.c.bf16 %v463_v12, %v461_v16  ;;  %v423_v23 = vadd.f32 %v422_v13, %v1139_v60 }
 0x1c9   :  { %v424_v17 = vpop.f32.mrf.mxu1 }
 0x1ca   :  { %v484_v18 = vpack.c.bf16 %v464_v15, %v462_v14  ;;  %v425_v21 = vadd.f32 %v424_v17, %v1137_v59  ;;  %v465_v30 = vmax.f32 %v423_v23, 0.0 }
 0x1cb   :  { %v426_v20 = vpop.f32.mrf.mxu1 }
 0x1cc   :  { %v427_v22 = vadd.f32 %v426_v20, %v1139_v60  ;;  %696 = vmatprep.mubr.bf16.mxu0 %v484_v18  ;;  %v466_v28 = vmax.f32 %v425_v21, 0.0 }
 0x1cd   :  { %v428_v24 = vpop.f32.mrf.mxu1  ;;  %697 = vmatmul.mubr.bf16.gmra.mxu0 %v483_v19 }
 0x1ce   :  { %v429_v25 = vadd.f32 %v428_v24, %v1137_v59  ;;  %v467_v26 = vmax.f32 %v427_v22, 0.0 }
 0x1cf   :  { %v432_v27 = vpop.f32.mrf.mxu1 }
 0x1d0   :  { %v468_v29 = vmax.f32 %v429_v25, 0.0  ;;  %v485_v33 = vpack.c.bf16 %v467_v26, %v465_v30  ;;  %v433_v37 = vadd.f32 %v432_v27, %v1139_v60 }
 0x1d1   :  { %v434_v31 = vpop.f32.mrf.mxu1 }
 0x1d2   :  { %v486_v32 = vpack.c.bf16 %v468_v29, %v466_v28  ;;  %v435_v35 = vadd.f32 %v434_v31, %v1137_v59  ;;  %v469_v44 = vmax.f32 %v433_v37, 0.0 }
 0x1d3   :  { %v436_v34 = vpop.f32.mrf.mxu1 }
 0x1d4   :  { %v437_v36 = vadd.f32 %v436_v34, %v1139_v60  ;;  %704 = vmatprep.mubr.bf16.mxu0 %v486_v32  ;;  %v470_v41 = vmax.f32 %v435_v35, 0.0 }
 0x1d5   :  { %v438_v38 = vpop.f32.mrf.mxu1  ;;  %705 = vmatmul.mubr.bf16.gmra.mxu0 %v485_v33 }
 0x1d6   :  { %v439_v39 = vadd.f32 %v438_v38, %v1137_v59  ;;  %v471_v40 = vmax.f32 %v437_v36, 0.0 }
 0x1d8   :  { %v472_v42 = vmax.f32 %v439_v39, 0.0  ;;  %v487_v46 = vpack.c.bf16 %v471_v40, %v469_v44 }
 0x1da   :  { %v488_v45 = vpack.c.bf16 %v472_v42, %v470_v41 }
 0x1dc   :  { %712 = vmatprep.mubr.bf16.mxu0 %v488_v45 }
 0x1dd   :  { %713 = vmatmul.mubr.bf16.gmra.mxu0 %v487_v46 }
 0x265   :  { %v812_v47 = vpop.f32.mrf.mxu0 }
 0x267   :  { %v813_v49 = vpop.f32.mrf.mxu0 }
 0x268   :  { %v814_v60 = vadd.f32 %v813_v49, %v812_v47 }
 0x269   :  { %v815_v50 = vpop.f32.mrf.mxu0 }
 0x26a   :  { %v659_v59 = vadd.f32 %v814_v60, %v1176_v48 }
 0x26b   :  { %v816_v43 = vpop.f32.mrf.mxu0 }
 0x26c   :  { %722 = vst.msk [vmem:[%s1265_s7] sm:$0xff] %vm721_vm2, %v659_v59  ;;  %v817_v51 = vadd.f32 %v816_v43, %v815_v50 }
 0x26d   :  { %v818_v52 = vpop.f32.mrf.mxu0 }
 0x26e   :  { %v662_v53 = vadd.f32 %v817_v51, %v1176_v48 }
 0x26f   :  { %v819_v54 = vpop.f32.mrf.mxu0 }
 0x270   :  { %723 = vst.msk [vmem:[%s1265_s7 + $0x8] sm:$0xff] %vm721_vm2, %v662_v53  ;;  %v820_v55 = vadd.f32 %v819_v54, %v818_v52 }
 0x271   :  { %v821_v56 = vpop.f32.mrf.mxu0 }
 0x272   :  { %v667_v57 = vadd.f32 %v820_v55, %v1176_v48 }
 0x273   :  { %v822_v58 = vpop.f32.mrf.mxu0 }
 0x274   :  { %724 = vst.msk [vmem:[%s1265_s7 + $0x10] sm:$0xff] %vm721_vm2, %v667_v57  ;;  %v823_v61 = vadd.f32 %v822_v58, %v821_v56 }
 0x275   :  { %v824_v62 = vpop.f32.mrf.mxu0 }
 0x276   :  { %v670_v63 = vadd.f32 %v823_v61, %v1176_v48 }
 0x277   :  { %v825_v0 = vpop.f32.mrf.mxu0 }
 0x278   :  { %725 = vst.msk [vmem:[%s1265_s7 + $0x18] sm:$0xff] %vm721_vm2, %v670_v63  ;;  %v826_v1 = vadd.f32 %v825_v0, %v824_v62 }
 0x279   :  { %v827_v2 = vpop.f32.mrf.mxu0 }
 0x27a   :  { %v675_v3 = vadd.f32 %v826_v1, %v1176_v48 }
 0x27b   :  { %v828_v4 = vpop.f32.mrf.mxu0 }
 0x27c   :  { %726 = vst.msk [vmem:[%s1265_s7 + $0x20] sm:$0xff] %vm721_vm2, %v675_v3  ;;  %v829_v5 = vadd.f32 %v828_v4, %v827_v2 }
 0x27d   :  { %v830_v6 = vpop.f32.mrf.mxu0 }
 0x27e   :  { %v678_v7 = vadd.f32 %v829_v5, %v1176_v48 }
 0x27f   :  { %v831_v8 = vpop.f32.mrf.mxu0 }
 0x280   :  { %727 = vst.msk [vmem:[%s1265_s7 + $0x28] sm:$0xff] %vm721_vm2, %v678_v7  ;;  %v832_v9 = vadd.f32 %v831_v8, %v830_v6 }
 0x281   :  { %v833_v10 = vpop.f32.mrf.mxu0 }
 0x282   :  { %v683_v11 = vadd.f32 %v832_v9, %v1176_v48 }
 0x283   :  { %v834_v12 = vpop.f32.mrf.mxu0 }
 0x284   :  { %728 = vst.msk [vmem:[%s1265_s7 + $0x30] sm:$0xff] %vm721_vm2, %v683_v11  ;;  %v835_v13 = vadd.f32 %v834_v12, %v833_v10 }
 0x285   :  { %v836_v14 = vpop.f32.mrf.mxu0 }
 0x286   :  { %v686_v15 = vadd.f32 %v835_v13, %v1176_v48 }
 0x287   :  { %v837_v16 = vpop.f32.mrf.mxu0 }
 0x288   :  { %729 = vst.msk [vmem:[%s1265_s7 + $0x38] sm:$0xff] %vm721_vm2, %v686_v15  ;;  %v838_v17 = vadd.f32 %v837_v16, %v836_v14 }
 0x289   :  { %v839_v18 = vpop.f32.mrf.mxu0 }
 0x28a   :  { %v691_v19 = vadd.f32 %v838_v17, %v1176_v48 }
 0x28b   :  { %v840_v20 = vpop.f32.mrf.mxu0 }
 0x28c   :  { %730 = vst.msk [vmem:[%s1265_s7 + $0x40] sm:$0xff] %vm721_vm2, %v691_v19  ;;  %v841_v21 = vadd.f32 %v840_v20, %v839_v18 }
 0x28d   :  { %v842_v22 = vpop.f32.mrf.mxu0 }
 0x28e   :  { %v694_v23 = vadd.f32 %v841_v21, %v1176_v48 }
 0x28f   :  { %v843_v24 = vpop.f32.mrf.mxu0 }
 0x290   :  { %731 = vst.msk [vmem:[%s1265_s7 + $0x48] sm:$0xff] %vm721_vm2, %v694_v23  ;;  %v844_v25 = vadd.f32 %v843_v24, %v842_v22 }
 0x291   :  { %v845_v26 = vpop.f32.mrf.mxu0 }
 0x292   :  { %v699_v27 = vadd.f32 %v844_v25, %v1176_v48 }
 0x293   :  { %v846_v28 = vpop.f32.mrf.mxu0 }
 0x294   :  { %732 = vst.msk [vmem:[%s1265_s7 + $0x50] sm:$0xff] %vm721_vm2, %v699_v27  ;;  %v847_v29 = vadd.f32 %v846_v28, %v845_v26 }
 0x295   :  { %v848_v30 = vpop.f32.mrf.mxu0 }
 0x296   :  { %v702_v31 = vadd.f32 %v847_v29, %v1176_v48 }
 0x297   :  { %v849_v32 = vpop.f32.mrf.mxu0 }
 0x298   :  { %733 = vst.msk [vmem:[%s1265_s7 + $0x58] sm:$0xff] %vm721_vm2, %v702_v31  ;;  %v850_v33 = vadd.f32 %v849_v32, %v848_v30 }
 0x299   :  { %v851_v34 = vpop.f32.mrf.mxu0 }
 0x29a   :  { %v707_v35 = vadd.f32 %v850_v33, %v1176_v48 }
 0x29b   :  { %v852_v36 = vpop.f32.mrf.mxu0 }
 0x29c   :  { %734 = vst.msk [vmem:[%s1265_s7 + $0x60] sm:$0xff] %vm721_vm2, %v707_v35  ;;  %v853_v37 = vadd.f32 %v852_v36, %v851_v34 }
 0x29d   :  { %v854_v38 = vpop.f32.mrf.mxu0 }
 0x29e   :  { %v710_v39 = vadd.f32 %v853_v37, %v1176_v48 }
 0x29f   :  { %v855_v40 = vpop.f32.mrf.mxu0 }
 0x2a0   :  { %735 = vst.msk [vmem:[%s1265_s7 + $0x68] sm:$0xff] %vm721_vm2, %v710_v39  ;;  %v856_v41 = vadd.f32 %v855_v40, %v854_v38 }
 0x2a1   :  { %v857_v42 = vpop.f32.mrf.mxu0 }
 0x2a2   :  { %v715_v44 = vadd.f32 %v856_v41, %v1176_v48 }
 0x2a3   :  { %v858_v45 = vpop.f32.mrf.mxu0 }
 0x2a4   :  { %736 = vst.msk [vmem:[%s1265_s7 + $0x70] sm:$0xff] %vm721_vm2, %v715_v44  ;;  %v859_v46 = vadd.f32 %v858_v45, %v857_v42 }
 0x2a6   :  { %v718_v47 = vadd.f32 %v859_v46, %v1176_v48 }
 0x2a8   :  { %737 = vst.msk [vmem:[%s1265_s7 + $0x78] sm:$0xff] %vm721_vm2, %v718_v47 }

</bundles_post_ra>
